<compile_context>
chip_gen: v5e
topology: v5e:2x2
jax: 0.10.0
libtpu: 0.0.40
codegen_flags: <defaults>
</compile_context>

<pallas_src>
import functools

import jax
import jax.numpy as jnp
from jax.experimental import pallas as pl
from jax.experimental.pallas import tpu as pltpu

BN_EPS = 1e-5
LANE = 128


def _round_up(n, m):
    return ((n + m - 1) // m) * m


def _has_bf16_vpu():
    """v6e/v7x have a bf16 VALU; v5e and older do not (bf16 elementwise would be
    emulated there, so keep the f32 path).  Detection failure -> conservative f32."""
    try:
        kind = jax.devices()[0].device_kind.lower()
    except Exception:
        return False
    return not any(v in kind for v in ("v2", "v3", "v4", "v5"))


def _ffnn_kernel(num_linear, bf16_act, x_ref, *param_and_out_refs):
    """Fused forward. param_and_out_refs = w0, b0, w1, b1, ..., out_ref.

    Weights are bf16 (host-cast), biases f32, MXU accumulation in f32 via
    preferred_element_type.  Inter-layer activations are bf16; bias-add/ReLU run
    in bf16 when bf16_act (v6e/v7x), else in f32 (v5e).  Final layer stores f32.
    """
    out_ref = param_and_out_refs[-1]
    wb_refs = param_and_out_refs[:-1]

    h = x_ref[...].astype(jnp.bfloat16)
    for li in range(num_linear):
        w = wb_refs[2 * li][...]        # bf16
        b = wb_refs[2 * li + 1][...]    # f32, (1, dout)
        acc = jnp.dot(h, w, preferred_element_type=jnp.float32)
        if li < num_linear - 1:
            if bf16_act:
                h = jnp.maximum(acc.astype(jnp.bfloat16) + b.astype(jnp.bfloat16), 0.0)
            else:
                h = jnp.maximum(acc + b, 0.0).astype(jnp.bfloat16)
        else:
            out_ref[...] = (acc + b).astype(out_ref.dtype)


def prepare_params(bn_params, weights, biases, eps=BN_EPS, lane=LANE):
    """Fold eval-mode BatchNorm1d into the first Linear, zero-pad HIDDEN layer
    widths up to a multiple of `lane` (lane-dense matmuls), leave the final
    output width unpadded (small, lane-masked store but ~16x fewer HBM bytes),
    and cast weights to bf16.

    weights[i]: (in_i, out_i) so the kernel computes y = x @ W + b
    (equivalent to PyTorch's x @ W_pt.T + b). Returns (ws_bf16, bs_f32).
    """
    gamma, beta, mean, var = [jnp.asarray(p).reshape(-1) for p in bn_params]
    scale = gamma * jax.lax.rsqrt(var + eps)   # (F,)
    shift = beta - mean * scale                # (F,)

    w0 = scale[:, None] * weights[0]
    b0 = biases[0].reshape(1, -1) + shift[None, :] @ weights[0]
    ws_f32 = [w0] + list(weights[1:])
    bs_f32 = [b0] + [b.reshape(1, -1) for b in biases[1:]]

    num = len(ws_f32)
    ws, bs = [], []
    prev = ws_f32[0].shape[0]                  # input K left unpadded (cheap, contiguous)
    for li, (w, b) in enumerate(zip(ws_f32, bs_f32)):
        din, dout = w.shape
        dpad = dout if li == num - 1 else _round_up(dout, lane)
        # Zero-padded rows/cols are exact no-ops: padded h entries stay 0 through
        # ReLU and contribute nothing to later layers.
        w_p = jnp.zeros((prev, dpad), jnp.float32).at[:din, :dout].set(w)
        b_p = jnp.zeros((1, dpad), jnp.float32).at[:, :dout].set(b)
        ws.append(w_p.astype(jnp.bfloat16))
        bs.append(b_p)
        prev = dpad
    return ws, bs


def _resident_spec(shape, single_buffer):
    """Constant index_map -> operand stays resident in VMEM across grid steps.
    Optionally single-buffered (it is never re-fetched, so double-buffering only
    wastes VMEM - relevant on v7x's 64 MiB)."""
    idx = lambda i: (0, 0)
    if single_buffer:
        try:
            return pl.BlockSpec(shape, idx, pipeline_mode=pl.Buffered(1))
        except Exception:
            pass
    return pl.BlockSpec(shape, idx)


def constant_hidden_size_ffnn(x, ws_bf16, bs_f32, *, block_batch=2048, bf16_act=None):
    """x: (B, input_size) f32. ws_bf16 / bs_f32 from prepare_params().
    Returns (B, out_features) f32."""
    batch, in_features = x.shape
    num_linear = len(ws_bf16)
    out_features = ws_bf16[-1].shape[1]

    if bf16_act is None:
        bf16_act = _has_bf16_vpu()

    # Large, 16-aligned batch tile (amortizes ~0.35us/step overhead), capped at
    # ~batch/2 so small/medium batches still produce >= 2 grid steps (v7x dual-TC).
    tb = min(block_batch, _round_up(pl.cdiv(batch, 2), 16))
    grid = (pl.cdiv(batch, tb),)   # no host-side pad; Pallas masks the ragged tail

    operands = [x]
    for w, b in zip(ws_bf16, bs_f32):
        operands.extend([w, b])

    flops = 2 * batch * sum(w.shape[0] * w.shape[1] for w in ws_bf16)
    bytes_accessed = (batch * in_features * 4
                      + sum(int(w.size) * 2 for w in ws_bf16)
                      + sum(int(b.size) * 4 for b in bs_f32)
                      + batch * out_features * 4)

    def _run(fancy):
        in_specs = [pl.BlockSpec((tb, in_features), lambda i: (i, 0))]
        for w, b in zip(ws_bf16, bs_f32):
            in_specs.append(_resident_spec(w.shape, fancy))
            in_specs.append(_resident_spec(b.shape, fancy))
        extra = {}
        if fancy:
            extra["cost_estimate"] = pl.CostEstimate(
                flops=flops, transcendentals=0, bytes_accessed=bytes_accessed)
        return pl.pallas_call(
            functools.partial(_ffnn_kernel, num_linear, bf16_act),
            out_shape=jax.ShapeDtypeStruct((batch, out_features), jnp.float32),
            grid=grid,
            in_specs=in_specs,
            out_specs=pl.BlockSpec((tb, out_features), lambda i: (i, 0)),
            compiler_params=pltpu.CompilerParams(
                dimension_semantics=("parallel",)),
            **extra,
        )(*operands)

    try:
        return _run(True)
    except Exception:
        # Older jax without pipeline_mode / cost_estimate support: plain path.
        return _run(False)


def reference_f32(x, bn_params, weights, biases, eps=BN_EPS):
    """Plain-JAX f32 reference mirroring the PyTorch module (eval-mode BN)."""
    gamma, beta, mean, var = [jnp.asarray(p).reshape(-1) for p in bn_params]
    h = (x - mean) / jnp.sqrt(var + eps) * gamma + beta
    for i, (w, b) in enumerate(zip(weights, biases)):
        h = h @ w + b.reshape(-1)
        if i < len(weights) - 1:
            h = jnp.maximum(h, 0.0)
    return h


def reference_prepared(x, ws_bf16, bs_f32, bf16_act):
    """Reference mirroring the exact kernel numerics (folded/padded/bf16 params)."""
    h = x.astype(jnp.bfloat16)
    n = len(ws_bf16)
    acc = None
    for li, (w, b) in enumerate(zip(ws_bf16, bs_f32)):
        acc = jnp.dot(h, w, preferred_element_type=jnp.float32)
        if li < n - 1:
            if bf16_act:
                h = jnp.maximum(acc.astype(jnp.bfloat16) + b.astype(jnp.bfloat16), 0.0)
            else:
                h = jnp.maximum(acc + b, 0.0).astype(jnp.bfloat16)
        else:
            acc = acc + b
    return acc


if __name__ == "__main__":
    # Module hyperparameters (small, consistent with the PyTorch constructor).
    input_size = 16
    hidden_size = 32
    output_size = 8
    hidden_layers = 3          # -> hidden_layers + 1 = 4 Linear layers total
    batch = 64                 # tb caps at 32 -> grid=(2,) (two TC-shardable steps)

    key = jax.random.PRNGKey(0)
    keys = jax.random.split(key, 5 + 2 * (hidden_layers + 1))
    ki = iter(keys)

    x = jax.random.normal(next(ki), (batch, input_size), dtype=jnp.float32)

    # BatchNorm1d parameters (randomized to exercise the folded math).
    gamma = 1.0 + 0.1 * jax.random.normal(next(ki), (input_size,), jnp.float32)
    beta = 0.1 * jax.random.normal(next(ki), (input_size,), jnp.float32)
    running_mean = 0.1 * jax.random.normal(next(ki), (input_size,), jnp.float32)
    running_var = jnp.abs(
        1.0 + 0.1 * jax.random.normal(next(ki), (input_size,), jnp.float32))
    bn_params = (gamma, beta, running_mean, running_var)

    # Linear layers: (in, hidden), (hidden, hidden) x (hidden_layers-1), (hidden, out)
    dims = [input_size] + [hidden_size] * hidden_layers + [output_size]
    weights, biases = [], []
    for din, dout in zip(dims[:-1], dims[1:]):
        bound = 1.0 / float(din) ** 0.5   # matches PyTorch nn.Linear init range
        weights.append(
            jax.random.uniform(next(ki), (din, dout), jnp.float32, -bound, bound))
        biases.append(
            jax.random.uniform(next(ki), (dout,), jnp.float32, -bound, bound))

    ws_bf16, bs_f32 = prepare_params(bn_params, weights, biases)
    bf16_act = _has_bf16_vpu()

    out = constant_hidden_size_ffnn(x, ws_bf16, bs_f32, bf16_act=bf16_act)
    out = jax.block_until_ready(out)
    assert out.shape == (batch, output_size), out.shape

    # Exact-path check (same folded/padded/bf16 params, same accumulation dtype).
    ref_same = reference_prepared(x, ws_bf16, bs_f32, bf16_act)
    assert jnp.allclose(out, ref_same, atol=1e-3, rtol=1e-3), "mismatch vs prepared ref"

    # Sanity check vs the pure-f32 PyTorch-equivalent math (bf16 tolerance).
    ref_full = reference_f32(x, bn_params, weights, biases)
    assert jnp.allclose(out, ref_full, atol=5e-2, rtol=5e-2), "mismatch vs f32 ref"

    print("KERNEL_OK")
</pallas_src>

<mosaic_0001>
module attributes {stable_mosaic.version = 11 : i64} {
  func.func @_ffnn_kernel(%arg0: i32, %arg1: memref<32x16xf32, #tpu.memory_space<vmem>>, %arg2: memref<16x128xbf16, #tpu.memory_space<vmem>>, %arg3: memref<1x128xf32, #tpu.memory_space<vmem>>, %arg4: memref<128x128xbf16, #tpu.memory_space<vmem>>, %arg5: memref<1x128xf32, #tpu.memory_space<vmem>>, %arg6: memref<128x128xbf16, #tpu.memory_space<vmem>>, %arg7: memref<1x128xf32, #tpu.memory_space<vmem>>, %arg8: memref<128x8xbf16, #tpu.memory_space<vmem>>, %arg9: memref<1x8xf32, #tpu.memory_space<vmem>>, %arg10: memref<32x8xf32, #tpu.memory_space<vmem>>) attributes {dimension_semantics = [#tpu.dimension_semantics<parallel>], iteration_bounds = array<i64: 2>, scalar_prefetch = 0 : i64, scratch_operands = 0 : i64, tpu.core_type = #tpu.core_type<tc>, window_params = [{transform_indices = @transform_0, window_bounds = array<i64: 32, 16>}, {pipeline_mode = #tpu.pipeline_mode<synchronous>, transform_indices = @transform_1, window_bounds = array<i64: 16, 128>}, {pipeline_mode = #tpu.pipeline_mode<synchronous>, transform_indices = @transform_2, window_bounds = array<i64: 1, 128>}, {pipeline_mode = #tpu.pipeline_mode<synchronous>, transform_indices = @transform_3, window_bounds = array<i64: 128, 128>}, {pipeline_mode = #tpu.pipeline_mode<synchronous>, transform_indices = @transform_4, window_bounds = array<i64: 1, 128>}, {pipeline_mode = #tpu.pipeline_mode<synchronous>, transform_indices = @transform_5, window_bounds = array<i64: 128, 128>}, {pipeline_mode = #tpu.pipeline_mode<synchronous>, transform_indices = @transform_6, window_bounds = array<i64: 1, 128>}, {pipeline_mode = #tpu.pipeline_mode<synchronous>, transform_indices = @transform_7, window_bounds = array<i64: 128, 8>}, {pipeline_mode = #tpu.pipeline_mode<synchronous>, transform_indices = @transform_8, window_bounds = array<i64: 1, 8>}, {transform_indices = @transform_9, window_bounds = array<i64: 32, 8>}]} {
    %c0 = arith.constant 0 : index
    %c0_0 = arith.constant 0 : index
    %0 = vector.load %arg1[%c0, %c0_0] : memref<32x16xf32, #tpu.memory_space<vmem>>, vector<32x16xf32>
    %1 = arith.truncf %0 : vector<32x16xf32> to vector<32x16xbf16>
    %c0_1 = arith.constant 0 : index
    %c0_2 = arith.constant 0 : index
    %2 = vector.load %arg2[%c0_1, %c0_2] : memref<16x128xbf16, #tpu.memory_space<vmem>>, vector<16x128xbf16>
    %c0_3 = arith.constant 0 : index
    %c0_4 = arith.constant 0 : index
    %3 = vector.load %arg3[%c0_3, %c0_4] : memref<1x128xf32, #tpu.memory_space<vmem>>, vector<1x128xf32>
    %cst = arith.constant dense<0.000000e+00> : vector<32x128xf32>
    %4 = tpu.matmul %1, %2, %cst {dimension_numbers = #tpu.dot_dimension_numbers<[1], [0], [0], [1], [0, 0, 1, 1], [], []>} : vector<32x16xbf16>, vector<16x128xbf16>, vector<32x128xf32> -> vector<32x128xf32>
    %5 = arith.truncf %4 : vector<32x128xf32> to vector<32x128xbf16>
    %6 = arith.truncf %3 : vector<1x128xf32> to vector<1x128xbf16>
    %7 = vector.broadcast %6 : vector<1x128xbf16> to vector<32x128xbf16>
    %8 = arith.addf %5, %7 : vector<32x128xbf16>
    %cst_5 = arith.constant 0.000000e+00 : bf16
    %9 = vector.broadcast %cst_5 : bf16 to vector<32x128xbf16>
    %10 = arith.maximumf %8, %9 : vector<32x128xbf16>
    %c0_6 = arith.constant 0 : index
    %c0_7 = arith.constant 0 : index
    %11 = vector.load %arg4[%c0_6, %c0_7] : memref<128x128xbf16, #tpu.memory_space<vmem>>, vector<128x128xbf16>
    %c0_8 = arith.constant 0 : index
    %c0_9 = arith.constant 0 : index
    %12 = vector.load %arg5[%c0_8, %c0_9] : memref<1x128xf32, #tpu.memory_space<vmem>>, vector<1x128xf32>
    %cst_10 = arith.constant dense<0.000000e+00> : vector<32x128xf32>
    %13 = tpu.matmul %10, %11, %cst_10 {dimension_numbers = #tpu.dot_dimension_numbers<[1], [0], [0], [1], [0, 0, 1, 1], [], []>} : vector<32x128xbf16>, vector<128x128xbf16>, vector<32x128xf32> -> vector<32x128xf32>
    %14 = arith.truncf %13 : vector<32x128xf32> to vector<32x128xbf16>
    %15 = arith.truncf %12 : vector<1x128xf32> to vector<1x128xbf16>
    %16 = vector.broadcast %15 : vector<1x128xbf16> to vector<32x128xbf16>
    %17 = arith.addf %14, %16 : vector<32x128xbf16>
    %cst_11 = arith.constant 0.000000e+00 : bf16
    %18 = vector.broadcast %cst_11 : bf16 to vector<32x128xbf16>
    %19 = arith.maximumf %17, %18 : vector<32x128xbf16>
    %c0_12 = arith.constant 0 : index
    %c0_13 = arith.constant 0 : index
    %20 = vector.load %arg6[%c0_12, %c0_13] : memref<128x128xbf16, #tpu.memory_space<vmem>>, vector<128x128xbf16>
    %c0_14 = arith.constant 0 : index
    %c0_15 = arith.constant 0 : index
    %21 = vector.load %arg7[%c0_14, %c0_15] : memref<1x128xf32, #tpu.memory_space<vmem>>, vector<1x128xf32>
    %cst_16 = arith.constant dense<0.000000e+00> : vector<32x128xf32>
    %22 = tpu.matmul %19, %20, %cst_16 {dimension_numbers = #tpu.dot_dimension_numbers<[1], [0], [0], [1], [0, 0, 1, 1], [], []>} : vector<32x128xbf16>, vector<128x128xbf16>, vector<32x128xf32> -> vector<32x128xf32>
    %23 = arith.truncf %22 : vector<32x128xf32> to vector<32x128xbf16>
    %24 = arith.truncf %21 : vector<1x128xf32> to vector<1x128xbf16>
    %25 = vector.broadcast %24 : vector<1x128xbf16> to vector<32x128xbf16>
    %26 = arith.addf %23, %25 : vector<32x128xbf16>
    %cst_17 = arith.constant 0.000000e+00 : bf16
    %27 = vector.broadcast %cst_17 : bf16 to vector<32x128xbf16>
    %28 = arith.maximumf %26, %27 : vector<32x128xbf16>
    %c0_18 = arith.constant 0 : index
    %c0_19 = arith.constant 0 : index
    %29 = vector.load %arg8[%c0_18, %c0_19] : memref<128x8xbf16, #tpu.memory_space<vmem>>, vector<128x8xbf16>
    %c0_20 = arith.constant 0 : index
    %c0_21 = arith.constant 0 : index
    %30 = vector.load %arg9[%c0_20, %c0_21] : memref<1x8xf32, #tpu.memory_space<vmem>>, vector<1x8xf32>
    %cst_22 = arith.constant dense<0.000000e+00> : vector<32x8xf32>
    %31 = tpu.matmul %28, %29, %cst_22 {dimension_numbers = #tpu.dot_dimension_numbers<[1], [0], [0], [1], [0, 0, 1, 1], [], []>} : vector<32x128xbf16>, vector<128x8xbf16>, vector<32x8xf32> -> vector<32x8xf32>
    %32 = vector.broadcast %30 : vector<1x8xf32> to vector<32x8xf32>
    %33 = arith.addf %31, %32 : vector<32x8xf32>
    %c0_23 = arith.constant 0 : index
    %c0_24 = arith.constant 0 : index
    %34 = vector.load %arg10[%c0_23, %c0_24] : memref<32x8xf32, #tpu.memory_space<vmem>>, vector<32x8xf32>
    tpu.vector_store %arg10[%c0_23, %c0_24], %33 {strides = array<i32>} : memref<32x8xf32, #tpu.memory_space<vmem>>, vector<32x8xf32>,
    return
  }
  func.func @transform_0(%arg0: i32) -> (i32, i32) {
    %c0_i32 = arith.constant 0 : i32
    %c0_i32_0 = arith.constant 0 : i32
    return %arg0, %c0_i32 : i32, i32
  }
  func.func @transform_1(%arg0: i32) -> (i32, i32) {
    %c0_i32 = arith.constant 0 : i32
    %c0_i32_0 = arith.constant 0 : i32
    %c0_i32_1 = arith.constant 0 : i32
    return %c0_i32, %c0_i32_0 : i32, i32
  }
  func.func @transform_2(%arg0: i32) -> (i32, i32) {
    %c0_i32 = arith.constant 0 : i32
    %c0_i32_0 = arith.constant 0 : i32
    %c0_i32_1 = arith.constant 0 : i32
    return %c0_i32, %c0_i32_0 : i32, i32
  }
  func.func @transform_3(%arg0: i32) -> (i32, i32) {
    %c0_i32 = arith.constant 0 : i32
    %c0_i32_0 = arith.constant 0 : i32
    %c0_i32_1 = arith.constant 0 : i32
    return %c0_i32, %c0_i32_0 : i32, i32
  }
  func.func @transform_4(%arg0: i32) -> (i32, i32) {
    %c0_i32 = arith.constant 0 : i32
    %c0_i32_0 = arith.constant 0 : i32
    %c0_i32_1 = arith.constant 0 : i32
    return %c0_i32, %c0_i32_0 : i32, i32
  }
  func.func @transform_5(%arg0: i32) -> (i32, i32) {
    %c0_i32 = arith.constant 0 : i32
    %c0_i32_0 = arith.constant 0 : i32
    %c0_i32_1 = arith.constant 0 : i32
    return %c0_i32, %c0_i32_0 : i32, i32
  }
  func.func @transform_6(%arg0: i32) -> (i32, i32) {
    %c0_i32 = arith.constant 0 : i32
    %c0_i32_0 = arith.constant 0 : i32
    %c0_i32_1 = arith.constant 0 : i32
    return %c0_i32, %c0_i32_0 : i32, i32
  }
  func.func @transform_7(%arg0: i32) -> (i32, i32) {
    %c0_i32 = arith.constant 0 : i32
    %c0_i32_0 = arith.constant 0 : i32
    %c0_i32_1 = arith.constant 0 : i32
    return %c0_i32, %c0_i32_0 : i32, i32
  }
  func.func @transform_8(%arg0: i32) -> (i32, i32) {
    %c0_i32 = arith.constant 0 : i32
    %c0_i32_0 = arith.constant 0 : i32
    %c0_i32_1 = arith.constant 0 : i32
    return %c0_i32, %c0_i32_0 : i32, i32
  }
  func.func @transform_9(%arg0: i32) -> (i32, i32) {
    %c0_i32 = arith.constant 0 : i32
    %c0_i32_0 = arith.constant 0 : i32
    return %arg0, %c0_i32 : i32, i32
  }
}

module attributes {stable_mosaic.version = 11 : i64} {
  func.func @_ffnn_kernel(%arg0: i32, %arg1: memref<32x16xf32, #tpu.memory_space<vmem>>, %arg2: memref<16x128xbf16, #tpu.memory_space<vmem>>, %arg3: memref<1x128xf32, #tpu.memory_space<vmem>>, %arg4: memref<128x128xbf16, #tpu.memory_space<vmem>>, %arg5: memref<1x128xf32, #tpu.memory_space<vmem>>, %arg6: memref<128x128xbf16, #tpu.memory_space<vmem>>, %arg7: memref<1x128xf32, #tpu.memory_space<vmem>>, %arg8: memref<128x8xbf16, #tpu.memory_space<vmem>>, %arg9: memref<1x8xf32, #tpu.memory_space<vmem>>, %arg10: memref<32x8xf32, #tpu.memory_space<vmem>>) attributes {dimension_semantics = [#tpu.dimension_semantics<parallel>], iteration_bounds = array<i64: 2>, scalar_prefetch = 0 : i64, scratch_operands = 0 : i64, tpu.core_type = #tpu.core_type<tc>, window_params = [{transform_indices = @transform_0, window_bounds = array<i64: 32, 16>}, {pipeline_mode = #tpu.pipeline_mode<synchronous>, transform_indices = @transform_1, window_bounds = array<i64: 16, 128>}, {pipeline_mode = #tpu.pipeline_mode<synchronous>, transform_indices = @transform_2, window_bounds = array<i64: 1, 128>}, {pipeline_mode = #tpu.pipeline_mode<synchronous>, transform_indices = @transform_3, window_bounds = array<i64: 128, 128>}, {pipeline_mode = #tpu.pipeline_mode<synchronous>, transform_indices = @transform_4, window_bounds = array<i64: 1, 128>}, {pipeline_mode = #tpu.pipeline_mode<synchronous>, transform_indices = @transform_5, window_bounds = array<i64: 128, 128>}, {pipeline_mode = #tpu.pipeline_mode<synchronous>, transform_indices = @transform_6, window_bounds = array<i64: 1, 128>}, {pipeline_mode = #tpu.pipeline_mode<synchronous>, transform_indices = @transform_7, window_bounds = array<i64: 128, 8>}, {pipeline_mode = #tpu.pipeline_mode<synchronous>, transform_indices = @transform_8, window_bounds = array<i64: 1, 8>}, {transform_indices = @transform_9, window_bounds = array<i64: 32, 8>}]} {
    %c0 = arith.constant 0 : index
    %c0_0 = arith.constant 0 : index
    %0 = vector.load %arg1[%c0, %c0_0] : memref<32x16xf32, #tpu.memory_space<vmem>>, vector<32x16xf32>
    %1 = arith.truncf %0 : vector<32x16xf32> to vector<32x16xbf16>
    %c0_1 = arith.constant 0 : index
    %c0_2 = arith.constant 0 : index
    %2 = vector.load %arg2[%c0_1, %c0_2] : memref<16x128xbf16, #tpu.memory_space<vmem>>, vector<16x128xbf16>
    %c0_3 = arith.constant 0 : index
    %c0_4 = arith.constant 0 : index
    %3 = vector.load %arg3[%c0_3, %c0_4] : memref<1x128xf32, #tpu.memory_space<vmem>>, vector<1x128xf32>
    %cst = arith.constant dense<0.000000e+00> : vector<32x128xf32>
    %4 = tpu.matmul %1, %2, %cst {dimension_numbers = #tpu.dot_dimension_numbers<[1], [0], [0], [1], [0, 0, 1, 1], [], []>} : vector<32x16xbf16>, vector<16x128xbf16>, vector<32x128xf32> -> vector<32x128xf32>
    %5 = arith.truncf %4 : vector<32x128xf32> to vector<32x128xbf16>
    %6 = arith.truncf %3 : vector<1x128xf32> to vector<1x128xbf16>
    %7 = vector.broadcast %6 : vector<1x128xbf16> to vector<32x128xbf16>
    %8 = arith.addf %5, %7 : vector<32x128xbf16>
    %cst_5 = arith.constant 0.000000e+00 : bf16
    %9 = vector.broadcast %cst_5 : bf16 to vector<32x128xbf16>
    %10 = arith.maximumf %8, %9 : vector<32x128xbf16>
    %c0_6 = arith.constant 0 : index
    %c0_7 = arith.constant 0 : index
    %11 = vector.load %arg4[%c0_6, %c0_7] : memref<128x128xbf16, #tpu.memory_space<vmem>>, vector<128x128xbf16>
    %c0_8 = arith.constant 0 : index
    %c0_9 = arith.constant 0 : index
    %12 = vector.load %arg5[%c0_8, %c0_9] : memref<1x128xf32, #tpu.memory_space<vmem>>, vector<1x128xf32>
    %cst_10 = arith.constant dense<0.000000e+00> : vector<32x128xf32>
    %13 = tpu.matmul %10, %11, %cst_10 {dimension_numbers = #tpu.dot_dimension_numbers<[1], [0], [0], [1], [0, 0, 1, 1], [], []>} : vector<32x128xbf16>, vector<128x128xbf16>, vector<32x128xf32> -> vector<32x128xf32>
    %14 = arith.truncf %13 : vector<32x128xf32> to vector<32x128xbf16>
    %15 = arith.truncf %12 : vector<1x128xf32> to vector<1x128xbf16>
    %16 = vector.broadcast %15 : vector<1x128xbf16> to vector<32x128xbf16>
    %17 = arith.addf %14, %16 : vector<32x128xbf16>
    %cst_11 = arith.constant 0.000000e+00 : bf16
    %18 = vector.broadcast %cst_11 : bf16 to vector<32x128xbf16>
    %19 = arith.maximumf %17, %18 : vector<32x128xbf16>
    %c0_12 = arith.constant 0 : index
    %c0_13 = arith.constant 0 : index
    %20 = vector.load %arg6[%c0_12, %c0_13] : memref<128x128xbf16, #tpu.memory_space<vmem>>, vector<128x128xbf16>
    %c0_14 = arith.constant 0 : index
    %c0_15 = arith.constant 0 : index
    %21 = vector.load %arg7[%c0_14, %c0_15] : memref<1x128xf32, #tpu.memory_space<vmem>>, vector<1x128xf32>
    %cst_16 = arith.constant dense<0.000000e+00> : vector<32x128xf32>
    %22 = tpu.matmul %19, %20, %cst_16 {dimension_numbers = #tpu.dot_dimension_numbers<[1], [0], [0], [1], [0, 0, 1, 1], [], []>} : vector<32x128xbf16>, vector<128x128xbf16>, vector<32x128xf32> -> vector<32x128xf32>
    %23 = arith.truncf %22 : vector<32x128xf32> to vector<32x128xbf16>
    %24 = arith.truncf %21 : vector<1x128xf32> to vector<1x128xbf16>
    %25 = vector.broadcast %24 : vector<1x128xbf16> to vector<32x128xbf16>
    %26 = arith.addf %23, %25 : vector<32x128xbf16>
    %cst_17 = arith.constant 0.000000e+00 : bf16
    %27 = vector.broadcast %cst_17 : bf16 to vector<32x128xbf16>
    %28 = arith.maximumf %26, %27 : vector<32x128xbf16>
    %c0_18 = arith.constant 0 : index
    %c0_19 = arith.constant 0 : index
    %29 = vector.load %arg8[%c0_18, %c0_19] : memref<128x8xbf16, #tpu.memory_space<vmem>>, vector<128x8xbf16>
    %c0_20 = arith.constant 0 : index
    %c0_21 = arith.constant 0 : index
    %30 = vector.load %arg9[%c0_20, %c0_21] : memref<1x8xf32, #tpu.memory_space<vmem>>, vector<1x8xf32>
    %cst_22 = arith.constant dense<0.000000e+00> : vector<32x8xf32>
    %31 = tpu.matmul %28, %29, %cst_22 {dimension_numbers = #tpu.dot_dimension_numbers<[1], [0], [0], [1], [0, 0, 1, 1], [], []>} : vector<32x128xbf16>, vector<128x8xbf16>, vector<32x8xf32> -> vector<32x8xf32>
    %32 = vector.broadcast %30 : vector<1x8xf32> to vector<32x8xf32>
    %33 = arith.addf %31, %32 : vector<32x8xf32>
    %c0_23 = arith.constant 0 : index
    %c0_24 = arith.constant 0 : index
    %34 = vector.load %arg10[%c0_23, %c0_24] : memref<32x8xf32, #tpu.memory_space<vmem>>, vector<32x8xf32>
    tpu.vector_store %arg10[%c0_23, %c0_24], %33 {strides = array<i32>} : memref<32x8xf32, #tpu.memory_space<vmem>>, vector<32x8xf32>,
    return
  }
  func.func @transform_0(%arg0: i32) -> (i32, i32) {
    %c0_i32 = arith.constant 0 : i32
    %c0_i32_0 = arith.constant 0 : i32
    return %arg0, %c0_i32 : i32, i32
  }
  func.func @transform_1(%arg0: i32) -> (i32, i32) {
    %c0_i32 = arith.constant 0 : i32
    %c0_i32_0 = arith.constant 0 : i32
    %c0_i32_1 = arith.constant 0 : i32
    return %c0_i32, %c0_i32_0 : i32, i32
  }
  func.func @transform_2(%arg0: i32) -> (i32, i32) {
    %c0_i32 = arith.constant 0 : i32
    %c0_i32_0 = arith.constant 0 : i32
    %c0_i32_1 = arith.constant 0 : i32
    return %c0_i32, %c0_i32_0 : i32, i32
  }
  func.func @transform_3(%arg0: i32) -> (i32, i32) {
    %c0_i32 = arith.constant 0 : i32
    %c0_i32_0 = arith.constant 0 : i32
    %c0_i32_1 = arith.constant 0 : i32
    return %c0_i32, %c0_i32_0 : i32, i32
  }
  func.func @transform_4(%arg0: i32) -> (i32, i32) {
    %c0_i32 = arith.constant 0 : i32
    %c0_i32_0 = arith.constant 0 : i32
    %c0_i32_1 = arith.constant 0 : i32
    return %c0_i32, %c0_i32_0 : i32, i32
  }
  func.func @transform_5(%arg0: i32) -> (i32, i32) {
    %c0_i32 = arith.constant 0 : i32
    %c0_i32_0 = arith.constant 0 : i32
    %c0_i32_1 = arith.constant 0 : i32
    return %c0_i32, %c0_i32_0 : i32, i32
  }
  func.func @transform_6(%arg0: i32) -> (i32, i32) {
    %c0_i32 = arith.constant 0 : i32
    %c0_i32_0 = arith.constant 0 : i32
    %c0_i32_1 = arith.constant 0 : i32
    return %c0_i32, %c0_i32_0 : i32, i32
  }
  func.func @transform_7(%arg0: i32) -> (i32, i32) {
    %c0_i32 = arith.constant 0 : i32
    %c0_i32_0 = arith.constant 0 : i32
    %c0_i32_1 = arith.constant 0 : i32
    return %c0_i32, %c0_i32_0 : i32, i32
  }
  func.func @transform_8(%arg0: i32) -> (i32, i32) {
    %c0_i32 = arith.constant 0 : i32
    %c0_i32_0 = arith.constant 0 : i32
    %c0_i32_1 = arith.constant 0 : i32
    return %c0_i32, %c0_i32_0 : i32, i32
  }
  func.func @transform_9(%arg0: i32) -> (i32, i32) {
    %c0_i32 = arith.constant 0 : i32
    %c0_i32_0 = arith.constant 0 : i32
    return %arg0, %c0_i32 : i32, i32
  }
}

</mosaic_0001>

<bundles_post_ra>
// kernel: tpu_custom_call.1
= control target key start
LH: loop header
LB: loop body
LE: loop exit
PB: predicated region body
PF: predicated region fallthrough
CT: control target
= control target key end

     0   :  { %s1003_s30 = smov 0   ;;  %s1114_s0 = inlined_call_operand.vmem [shape: f32[64,16], index: 0, kind: input, shape index: {}]   ;;  %s1115_s1 = inlined_call_operand.vmem [shape: bf16[16,128], index: 1, kind: input, shape index: {}]   ;;  %s1116_s2 = inlined_call_operand.vmem [shape: f32[1,128], index: 2, kind: input, shape index: {}]   ;;  %s1117_s3 = inlined_call_operand.vmem [shape: bf16[128,128], index: 3, kind: input, shape index: {}]   ;;  %s1118_s4 = inlined_call_operand.vmem [shape: f32[1,128], index: 4, kind: input, shape index: {}]   ;;  %s1119_s5 = inlined_call_operand.vmem [shape: bf16[128,128], index: 5, kind: input, shape index: {}]   ;;  %s1120_s6 = inlined_call_operand.vmem [shape: f32[1,128], index: 6, kind: input, shape index: {}]   ;;  %s1121_s7 = inlined_call_operand.vmem [shape: bf16[128,8], index: 7, kind: input, shape index: {}]   ;;  %s1122_s8 = inlined_call_operand.vmem [shape: f32[1,8], index: 8, kind: input, shape index: {}]   ;;  %s1123_s9 = inlined_call_operand.vmem [shape: f32[64,8], index: 9, kind: output, shape index: {}]  }
   0x1 LB: > { %s790_s10 = sadd.s32 4294967295, %s951_s30   ;;  %p794_p0 = scmp.ge.s32.totalorder %s951_s30, 1  ;;  %s951_s30 = sphi %s1003_s30, %s19_s30  }
   0x2   : > { %p288_p1 = scmp.lt.s32.totalorder %s951_s30, 3 }
   0x4   : > { %p289_p2 = pnand %p794_p0, %p288_p1 }
   0x5   : > { %s795_s13 = sshll.u32 (!%p289_p2), %s790_s10, 2 }
   0x6   : > { %292 = sbr.rel (%p289_p2) target bundleno = 614 (0x266), region = 56  ;;  %p325_p3 = scmp.lt.s32.totalorder (!%p289_p2), %s795_s13, 7 }
   0xb   : > { %v903_v0 = vld [vmem:[%s1115_s1] sm:$0xff]  ;;  %v911_v1 = vld [vmem:[%s1117_s3 + $0x38] sm:$0xff]  ;;  %s1125_s13 = smov (!%p325_p3, %s795_s13), 7  ;;  %v910_v2 = vld [vmem:[%s1117_s3 + $0x30] sm:$0xff]  ;;  %vm352_vm0 = vcmask 130048   ;;  %vm729_vm1 = vcmask 64512  }
   0xc   : > { %366 = vmatpush.bf16.msra.mxu0 %v903_v0  ;;  %928 = vmatpush.bf16.msra.mxu1 %v911_v1  ;;  %s796_s18 = sshll.u32 %s1125_s13, 3  ;;  %v909_v5 = vld [vmem:[%s1117_s3 + $0x28] sm:$0xff]  ;;  %v908_v7 = vld [vmem:[%s1117_s3 + $0x20] sm:$0xff]  ;;  %v907_v11 = vld [vmem:[%s1117_s3 + $0x18] sm:$0xff] }
   0xd   : > { %s328_s21 = scalar_lea.vmem %s1114_s0, %s796_s18  ;;  %v906_v12 = vld [vmem:[%s1117_s3 + $0x10] sm:$0xff]  ;;  %v905_v13 = vld [vmem:[%s1117_s3 + $0x8] sm:$0xff]  ;;  %v904_v14 = vld [vmem:[%s1117_s3] sm:$0xff]  ;;  %s334_s22 = scalar_lea.vmem %s1123_s9, %s796_s18 }
   0xe   : > { %v337_v3 = vld [vmem:[%s328_s21] sm:$0xff]  ;;  %v338_v4 = vld [vmem:[%s328_s21 + $0x8] sm:$0xff]  ;;  %v339_v8 = vld [vmem:[%s328_s21 + $0x10] sm:$0xff] }
   0xf   : > { %v341_v6 = vpack.c.bf16 %v338_v4, %v337_v3  ;;  %v340_v9 = vld [vmem:[%s328_s21 + $0x18] sm:$0xff]  ;;  %v345_v15 = vld [vmem:[%s1116_s2] sm:$0x1]  ;;  %v918_v22 = vld [vmem:[%s1119_s5 + $0x30] sm:$0xff] }
  0x10   : > { %475 = vmatpush.bf16.msrb.mxu0 %v911_v1  ;;  %929 = vmatpush.bf16.msra.mxu1 %v910_v2  ;;  %v342_v10 = vpack.c.bf16 %v340_v9, %v339_v8  ;;  %v382_v16 = vpack.c.bf16 %v345_v15, %v345_v15  ;;  %v919_v21 = vld [vmem:[%s1119_s5 + $0x38] sm:$0xff]  ;;  %v917_v27 = vld [vmem:[%s1119_s5 + $0x28] sm:$0xff]  ;;  %v916_v45 = vld [vmem:[%s1119_s5 + $0x20] sm:$0xff] }
  0x11   : > { %803 = vmatmul.msk.bf16.vlgmr.msra.gmra.mxu0 %vm352_vm0, %v341_v6  ;;  %591 = vmatpush.bf16.msra.mxu2 %v919_v21  ;;  %v915_v46 = vld [vmem:[%s1119_s5 + $0x18] sm:$0xff]  ;;  %v914_v47 = vld [vmem:[%s1119_s5 + $0x10] sm:$0xff]  ;;  %v913_v48 = vld [vmem:[%s1119_s5 + $0x8] sm:$0xff] }
  0x12   : > { %v384_v17 = vpack.i.b16 %v382_v16, %v382_v16  ;;  %v912_v49 = vld [vmem:[%s1119_s5] sm:$0xff]  ;;  %v927_v56 = vld [vmem:[%s1121_s7 + $0x38] sm:$0xff]  ;;  %v926_v57 = vld [vmem:[%s1121_s7 + $0x30] sm:$0xff] }
  0x13   : > { %v426_v50 = vld [vmem:[%s1118_s4] sm:$0x1]  ;;  %710 = vmatpush.bf16.msra.mxu3 %v927_v56  ;;  %v925_v62 = vld [vmem:[%s1121_s7 + $0x28] sm:$0xff] }
  0x14   : > { %476 = vmatpush.bf16.msrb.mxu0 %v910_v2  ;;  %930 = vmatpush.bf16.msra.mxu1 %v909_v5  ;;  %v386_v20 = vperm.slane %v384_v17, 0  ;;  %v498_v51 = vpack.c.bf16 %v426_v50, %v426_v50  ;;  %v924_v16 = vld [vmem:[%s1121_s7 + $0x20] sm:$0xff]  ;;  %v923_v17 = vld [vmem:[%s1121_s7 + $0x18] sm:$0xff] }
  0x15   : > { %592 = vmatpush.bf16.msra.mxu2 %v918_v22  ;;  %v542_v21 = vld [vmem:[%s1120_s6] sm:$0x1] }
  0x16   : > { %v391_v24 = vunpack.c.l.bf16 %v386_v20  ;;  %v500_v52 = vpack.i.b16 %v498_v51, %v498_v51  ;;  %v920_v20 = vld [vmem:[%s1121_s7] sm:$0xff]  ;;  %v614_v22 = vpack.c.bf16 %v542_v21, %v542_v21 }
  0x17   : > { %711 = vmatpush.bf16.msra.mxu3 %v926_v57 }
  0x18   : > { %477 = vmatpush.bf16.msrb.mxu0 %v909_v5  ;;  %931 = vmatpush.bf16.msra.mxu1 %v908_v7  ;;  %v502_v55 = vperm.slane %v500_v52, 0 }
  0x19   : > { %593 = vmatpush.bf16.msra.mxu2 %v917_v27 }
  0x1a   : > { %v507_v59 = vunpack.c.l.bf16 %v502_v55 }
  0x1b   : > { %712 = vmatpush.bf16.msra.mxu3 %v925_v62 }
  0x1c   : > { %478 = vmatpush.bf16.msrb.mxu0 %v908_v7  ;;  %932 = vmatpush.bf16.msra.mxu1 %v907_v11 }
  0x1d   : > { %594 = vmatpush.bf16.msra.mxu2 %v916_v45 }
  0x1f   : > { %713 = vmatpush.bf16.msra.mxu3 %v924_v16 }
  0x20   : > { %479 = vmatpush.bf16.msrb.mxu0 %v907_v11  ;;  %933 = vmatpush.bf16.msra.mxu1 %v906_v12 }
  0x21   : > { %804 = vmatmul.msk.bf16.gmra.mxu0 %vm352_vm0, %v342_v10  ;;  %595 = vmatpush.bf16.msra.mxu2 %v915_v46 }
  0x23   : > { %714 = vmatpush.bf16.msra.mxu3 %v923_v17 }
  0x24   : > { %480 = vmatpush.bf16.msrb.mxu0 %v906_v12  ;;  %934 = vmatpush.bf16.msra.mxu1 %v905_v13 }
  0x25   : > { %596 = vmatpush.bf16.msra.mxu2 %v914_v47 }
  0x28   : > { %481 = vmatpush.bf16.msrb.mxu0 %v905_v13  ;;  %935 = vmatpush.bf16.msra.mxu1 %v904_v14 }
  0x29   : > { %597 = vmatpush.bf16.msra.mxu2 %v913_v48  ;;  %v944_v48 = vld [vmem:[%s1122_s8] ss:$0 sm:$0xff] }
  0x2c   : > { %482 = vmatpush.bf16.msrb.mxu0 %v904_v14 }
  0x2d   : > { %598 = vmatpush.bf16.msra.mxu2 %v912_v49 }
  0x8e   : > { %v368_v18 = vpop.f32.mrf.mxu0 }
  0x8f   : > { %v378_v19 = vpack.c.bf16 %v368_v18, %v368_v18  ;;  %v922_v18 = vld [vmem:[%s1121_s7 + $0x10] sm:$0xff] }
  0x90   : > { %715 = vmatpush.bf16.msra.mxu3 %v922_v18 }
  0x91   : > { %v387_v23 = vunpack.c.l.bf16 %v378_v19  ;;  %v921_v19 = vld [vmem:[%s1121_s7 + $0x8] sm:$0xff] }
  0x93   : > { %v392_v28 = vadd.f32 %v391_v24, %v387_v23  ;;  %v616_v23 = vpack.i.b16 %v614_v22, %v614_v22 }
  0x94   : > { %716 = vmatpush.bf16.msra.mxu3 %v921_v19 }
  0x95   : > { %v404_v31 = vmax.f32 %v392_v28, 0.0 }
  0x96   : > { %v370_v25 = vpop.f32.mrf.mxu0 }
  0x97   : > { %v379_v26 = vpack.c.bf16 %v370_v25, %v370_v25 }
  0x98   : > { %717 = vmatpush.bf16.msra.mxu3 %v920_v20 }
  0x99   : > { %v388_v29 = vunpack.c.l.bf16 %v379_v26  ;;  %v618_v26 = vperm.slane %v616_v23, 0 }
  0x9b   : > { %v393_v30 = vadd.f32 %v391_v24, %v388_v29  ;;  %v623_v28 = vunpack.c.l.bf16 %v618_v26 }
  0x9d   : > { %v405_v32 = vmax.f32 %v393_v30, 0.0 }
  0x9e   : > { %v373_v33 = vpop.f32.mrf.mxu0 }
  0x9f   : > { %v408_v34 = vpack.c.bf16 %v405_v32, %v404_v31  ;;  %v380_v35 = vpack.c.bf16 %v373_v33, %v373_v33 }
  0xa1   : > { %483 = vmatmul.bf16.vlgmr.msrb.gmra.mxu0 %v408_v34  ;;  %v389_v36 = vunpack.c.l.bf16 %v380_v35 }
  0xa3   : > { %v394_v39 = vadd.f32 %v391_v24, %v389_v36 }
  0xa5   : > { %v406_v42 = vmax.f32 %v394_v39, 0.0 }
  0xa6   : > { %v375_v37 = vpop.f32.mrf.mxu0 }
  0xa7   : > { %v381_v38 = vpack.c.bf16 %v375_v37, %v375_v37 }
  0xa9   : > { %v390_v40 = vunpack.c.l.bf16 %v381_v38 }
  0xab   : > { %v395_v41 = vadd.f32 %v391_v24, %v390_v40 }
  0xad   : > { %v407_v43 = vmax.f32 %v395_v41, 0.0 }
  0xaf   : > { %v409_v44 = vpack.c.bf16 %v407_v43, %v406_v42 }
  0xb1   : > { %488 = vmatmul.bf16.vlgmr.msra.gmra.mxu1 %v409_v44 }
 0x11e   : > { %v484_v53 = vpop.f32.mrf.mxu0 }
 0x11f   : > { %v494_v54 = vpack.c.bf16 %v484_v53, %v484_v53 }
 0x121   : > { %v503_v58 = vunpack.c.l.bf16 %v494_v54 }
 0x123   : > { %v508_v63 = vadd.f32 %v507_v59, %v503_v58 }
 0x125   : > { %v520_v3 = vmax.f32 %v508_v63, 0.0 }
 0x126   : > { %v486_v60 = vpop.f32.mrf.mxu0 }
 0x127   : > { %v495_v61 = vpack.c.bf16 %v486_v60, %v486_v60 }
 0x129   : > { %v504_v0 = vunpack.c.l.bf16 %v495_v61 }
 0x12b   : > { %v509_v1 = vadd.f32 %v507_v59, %v504_v0 }
 0x12d   : > { %v521_v2 = vmax.f32 %v509_v1, 0.0 }
 0x12e   : > { %v489_v4 = vpop.f32.mrf.mxu1 }
 0x12f   : > { %v524_v5 = vpack.c.bf16 %v521_v2, %v520_v3  ;;  %v496_v6 = vpack.c.bf16 %v489_v4, %v489_v4 }
 0x131   : > { %599 = vmatmul.bf16.vlgmr.msra.gmra.mxu2 %v524_v5  ;;  %v505_v7 = vunpack.c.l.bf16 %v496_v6 }
 0x133   : > { %v510_v10 = vadd.f32 %v507_v59, %v505_v7 }
 0x135   : > { %v522_v14 = vmax.f32 %v510_v10, 0.0 }
 0x136   : > { %v491_v8 = vpop.f32.mrf.mxu1 }
 0x137   : > { %v497_v9 = vpack.c.bf16 %v491_v8, %v491_v8 }
 0x139   : > { %v506_v11 = vunpack.c.l.bf16 %v497_v9 }
 0x13b   : > { %v511_v12 = vadd.f32 %v507_v59, %v506_v11 }
 0x13d   : > { %v523_v13 = vmax.f32 %v511_v12, 0.0 }
 0x13f   : > { %v525_v15 = vpack.c.bf16 %v523_v13, %v522_v14 }
 0x141   : > { %604 = vmatmul.bf16.gmra.mxu2 %v525_v15 }
 0x1b4   : > { %v600_v24 = vpop.f32.mrf.mxu2 }
 0x1b5   : > { %v610_v25 = vpack.c.bf16 %v600_v24, %v600_v24 }
 0x1b7   : > { %v619_v27 = vunpack.c.l.bf16 %v610_v25 }
 0x1b9   : > { %v624_v31 = vadd.f32 %v623_v28, %v619_v27 }
 0x1bb   : > { %v636_v34 = vmax.f32 %v624_v31, 0.0 }
 0x1bc   : > { %v602_v29 = vpop.f32.mrf.mxu2 }
 0x1bd   : > { %v611_v30 = vpack.c.bf16 %v602_v29, %v602_v29 }
 0x1bf   : > { %v620_v32 = vunpack.c.l.bf16 %v611_v30 }
 0x1c1   : > { %v625_v33 = vadd.f32 %v623_v28, %v620_v32 }
 0x1c3   : > { %v637_v35 = vmax.f32 %v625_v33, 0.0 }
 0x1c4   : > { %v605_v36 = vpop.f32.mrf.mxu2 }
 0x1c5   : > { %v640_v37 = vpack.c.bf16 %v637_v35, %v636_v34  ;;  %v612_v38 = vpack.c.bf16 %v605_v36, %v605_v36 }
 0x1c7   : > { %718 = vmatmul.bf16.vlgmr.msra.gmra.mxu3 %v640_v37  ;;  %v621_v39 = vunpack.c.l.bf16 %v612_v38 }
 0x1c9   : > { %v626_v42 = vadd.f32 %v623_v28, %v621_v39 }
 0x1cb   : > { %v638_v46 = vmax.f32 %v626_v42, 0.0 }
 0x1cc   : > { %v607_v40 = vpop.f32.mrf.mxu2 }
 0x1cd   : > { %v613_v41 = vpack.c.bf16 %v607_v40, %v607_v40 }
 0x1cf   : > { %v622_v43 = vunpack.c.l.bf16 %v613_v41 }
 0x1d1   : > { %v627_v44 = vadd.f32 %v623_v28, %v622_v43 }
 0x1d3   : > { %v639_v45 = vmax.f32 %v627_v44, 0.0 }
 0x1d5   : > { %v641_v47 = vpack.c.bf16 %v639_v45, %v638_v46 }
 0x1d7   : > { %723 = vmatmul.bf16.gmra.mxu3 %v641_v47 }
 0x24a   : > { %v719_v49 = vpop.f32.mrf.mxu3 }
 0x24b   : > { %v720_v50 = vadd.f32 %v944_v48, %v719_v49 }
 0x24d   : > { %730 = vst.msk [vmem:[%s334_s22] sm:$0xff] %vm729_vm1, %v720_v50 }
 0x252   : > { %v721_v51 = vpop.f32.mrf.mxu3 }
 0x253   : > { %v722_v52 = vadd.f32 %v944_v48, %v721_v51 }
 0x255   : > { %731 = vst.msk [vmem:[%s334_s22 + $0x8] sm:$0xff] %vm729_vm1, %v722_v52 }
 0x25a   : > { %v724_v53 = vpop.f32.mrf.mxu3 }
 0x25b   : > { %v725_v54 = vadd.f32 %v944_v48, %v724_v53 }
 0x25d   : > { %732 = vst.msk [vmem:[%s334_s22 + $0x10] sm:$0xff] %vm729_vm1, %v725_v54 }
 0x262   : > { %v726_v55 = vpop.f32.mrf.mxu3 }
 0x263   : > { %v727_v56 = vadd.f32 %v944_v48, %v726_v55 }
 0x265   : > { %733 = vst.msk [vmem:[%s334_s22 + $0x18] sm:$0xff] %vm729_vm1, %v727_v56 }
 0x266 PF: > { %s19_s30 = sadd.s32 1, %s951_s30  }
 0x267   : > { %p16_p4 = scmp.ge.s32.totalorder %s19_s30, 4  }
 0x269   :  { %18 = sbr.rel (!%p16_p4) target bundleno = 1 (0x1), region = 86 }

// kernel: tpu_custom_call.1
= control target key start
LH: loop header
LB: loop body
LE: loop exit
PB: predicated region body
PF: predicated region fallthrough
CT: control target
= control target key end

     0   :  { %s1003_s30 = smov 0   ;;  %s1114_s0 = inlined_call_operand.vmem [shape: f32[64,16], index: 0, kind: input, shape index: {}]   ;;  %s1115_s1 = inlined_call_operand.vmem [shape: bf16[16,128], index: 1, kind: input, shape index: {}]   ;;  %s1116_s2 = inlined_call_operand.vmem [shape: f32[1,128], index: 2, kind: input, shape index: {}]   ;;  %s1117_s3 = inlined_call_operand.vmem [shape: bf16[128,128], index: 3, kind: input, shape index: {}]   ;;  %s1118_s4 = inlined_call_operand.vmem [shape: f32[1,128], index: 4, kind: input, shape index: {}]   ;;  %s1119_s5 = inlined_call_operand.vmem [shape: bf16[128,128], index: 5, kind: input, shape index: {}]   ;;  %s1120_s6 = inlined_call_operand.vmem [shape: f32[1,128], index: 6, kind: input, shape index: {}]   ;;  %s1121_s7 = inlined_call_operand.vmem [shape: bf16[128,8], index: 7, kind: input, shape index: {}]   ;;  %s1122_s8 = inlined_call_operand.vmem [shape: f32[1,8], index: 8, kind: input, shape index: {}]   ;;  %s1123_s9 = inlined_call_operand.vmem [shape: f32[64,8], index: 9, kind: output, shape index: {}]  }
   0x1 LB: > { %s790_s10 = sadd.s32 4294967295, %s951_s30   ;;  %p794_p0 = scmp.ge.s32.totalorder %s951_s30, 1  ;;  %s951_s30 = sphi %s1003_s30, %s19_s30  }
   0x2   : > { %p288_p1 = scmp.lt.s32.totalorder %s951_s30, 3 }
   0x4   : > { %p289_p2 = pnand %p794_p0, %p288_p1 }
   0x5   : > { %s795_s13 = sshll.u32 (!%p289_p2), %s790_s10, 2 }
   0x6   : > { %292 = sbr.rel (%p289_p2) target bundleno = 614 (0x266), region = 56  ;;  %p325_p3 = scmp.lt.s32.totalorder (!%p289_p2), %s795_s13, 7 }
   0xb   : > { %v903_v0 = vld [vmem:[%s1115_s1] sm:$0xff]  ;;  %v911_v1 = vld [vmem:[%s1117_s3 + $0x38] sm:$0xff]  ;;  %s1125_s13 = smov (!%p325_p3, %s795_s13), 7  ;;  %v910_v2 = vld [vmem:[%s1117_s3 + $0x30] sm:$0xff]  ;;  %vm352_vm0 = vcmask 130048   ;;  %vm729_vm1 = vcmask 64512  }
   0xc   : > { %366 = vmatpush.bf16.msra.mxu0 %v903_v0  ;;  %928 = vmatpush.bf16.msra.mxu1 %v911_v1  ;;  %s796_s18 = sshll.u32 %s1125_s13, 3  ;;  %v909_v5 = vld [vmem:[%s1117_s3 + $0x28] sm:$0xff]  ;;  %v908_v7 = vld [vmem:[%s1117_s3 + $0x20] sm:$0xff]  ;;  %v907_v11 = vld [vmem:[%s1117_s3 + $0x18] sm:$0xff] }
   0xd   : > { %s328_s21 = scalar_lea.vmem %s1114_s0, %s796_s18  ;;  %v906_v12 = vld [vmem:[%s1117_s3 + $0x10] sm:$0xff]  ;;  %v905_v13 = vld [vmem:[%s1117_s3 + $0x8] sm:$0xff]  ;;  %v904_v14 = vld [vmem:[%s1117_s3] sm:$0xff]  ;;  %s334_s22 = scalar_lea.vmem %s1123_s9, %s796_s18 }
   0xe   : > { %v337_v3 = vld [vmem:[%s328_s21] sm:$0xff]  ;;  %v338_v4 = vld [vmem:[%s328_s21 + $0x8] sm:$0xff]  ;;  %v339_v8 = vld [vmem:[%s328_s21 + $0x10] sm:$0xff] }
   0xf   : > { %v341_v6 = vpack.c.bf16 %v338_v4, %v337_v3  ;;  %v340_v9 = vld [vmem:[%s328_s21 + $0x18] sm:$0xff]  ;;  %v345_v15 = vld [vmem:[%s1116_s2] sm:$0x1]  ;;  %v918_v22 = vld [vmem:[%s1119_s5 + $0x30] sm:$0xff] }
  0x10   : > { %475 = vmatpush.bf16.msrb.mxu0 %v911_v1  ;;  %929 = vmatpush.bf16.msra.mxu1 %v910_v2  ;;  %v342_v10 = vpack.c.bf16 %v340_v9, %v339_v8  ;;  %v382_v16 = vpack.c.bf16 %v345_v15, %v345_v15  ;;  %v919_v21 = vld [vmem:[%s1119_s5 + $0x38] sm:$0xff]  ;;  %v917_v27 = vld [vmem:[%s1119_s5 + $0x28] sm:$0xff]  ;;  %v916_v45 = vld [vmem:[%s1119_s5 + $0x20] sm:$0xff] }
  0x11   : > { %803 = vmatmul.msk.bf16.vlgmr.msra.gmra.mxu0 %vm352_vm0, %v341_v6  ;;  %591 = vmatpush.bf16.msra.mxu2 %v919_v21  ;;  %v915_v46 = vld [vmem:[%s1119_s5 + $0x18] sm:$0xff]  ;;  %v914_v47 = vld [vmem:[%s1119_s5 + $0x10] sm:$0xff]  ;;  %v913_v48 = vld [vmem:[%s1119_s5 + $0x8] sm:$0xff] }
  0x12   : > { %v384_v17 = vpack.i.b16 %v382_v16, %v382_v16  ;;  %v912_v49 = vld [vmem:[%s1119_s5] sm:$0xff]  ;;  %v927_v56 = vld [vmem:[%s1121_s7 + $0x38] sm:$0xff]  ;;  %v926_v57 = vld [vmem:[%s1121_s7 + $0x30] sm:$0xff] }
  0x13   : > { %v426_v50 = vld [vmem:[%s1118_s4] sm:$0x1]  ;;  %710 = vmatpush.bf16.msra.mxu3 %v927_v56  ;;  %v925_v62 = vld [vmem:[%s1121_s7 + $0x28] sm:$0xff] }
  0x14   : > { %476 = vmatpush.bf16.msrb.mxu0 %v910_v2  ;;  %930 = vmatpush.bf16.msra.mxu1 %v909_v5  ;;  %v386_v20 = vperm.slane %v384_v17, 0  ;;  %v498_v51 = vpack.c.bf16 %v426_v50, %v426_v50  ;;  %v924_v16 = vld [vmem:[%s1121_s7 + $0x20] sm:$0xff]  ;;  %v923_v17 = vld [vmem:[%s1121_s7 + $0x18] sm:$0xff] }
  0x15   : > { %592 = vmatpush.bf16.msra.mxu2 %v918_v22  ;;  %v542_v21 = vld [vmem:[%s1120_s6] sm:$0x1] }
  0x16   : > { %v391_v24 = vunpack.c.l.bf16 %v386_v20  ;;  %v500_v52 = vpack.i.b16 %v498_v51, %v498_v51  ;;  %v920_v20 = vld [vmem:[%s1121_s7] sm:$0xff]  ;;  %v614_v22 = vpack.c.bf16 %v542_v21, %v542_v21 }
  0x17   : > { %711 = vmatpush.bf16.msra.mxu3 %v926_v57 }
  0x18   : > { %477 = vmatpush.bf16.msrb.mxu0 %v909_v5  ;;  %931 = vmatpush.bf16.msra.mxu1 %v908_v7  ;;  %v502_v55 = vperm.slane %v500_v52, 0 }
  0x19   : > { %593 = vmatpush.bf16.msra.mxu2 %v917_v27 }
  0x1a   : > { %v507_v59 = vunpack.c.l.bf16 %v502_v55 }
  0x1b   : > { %712 = vmatpush.bf16.msra.mxu3 %v925_v62 }
  0x1c   : > { %478 = vmatpush.bf16.msrb.mxu0 %v908_v7  ;;  %932 = vmatpush.bf16.msra.mxu1 %v907_v11 }
  0x1d   : > { %594 = vmatpush.bf16.msra.mxu2 %v916_v45 }
  0x1f   : > { %713 = vmatpush.bf16.msra.mxu3 %v924_v16 }
  0x20   : > { %479 = vmatpush.bf16.msrb.mxu0 %v907_v11  ;;  %933 = vmatpush.bf16.msra.mxu1 %v906_v12 }
  0x21   : > { %804 = vmatmul.msk.bf16.gmra.mxu0 %vm352_vm0, %v342_v10  ;;  %595 = vmatpush.bf16.msra.mxu2 %v915_v46 }
  0x23   : > { %714 = vmatpush.bf16.msra.mxu3 %v923_v17 }
  0x24   : > { %480 = vmatpush.bf16.msrb.mxu0 %v906_v12  ;;  %934 = vmatpush.bf16.msra.mxu1 %v905_v13 }
  0x25   : > { %596 = vmatpush.bf16.msra.mxu2 %v914_v47 }
  0x28   : > { %481 = vmatpush.bf16.msrb.mxu0 %v905_v13  ;;  %935 = vmatpush.bf16.msra.mxu1 %v904_v14 }
  0x29   : > { %597 = vmatpush.bf16.msra.mxu2 %v913_v48  ;;  %v944_v48 = vld [vmem:[%s1122_s8] ss:$0 sm:$0xff] }
  0x2c   : > { %482 = vmatpush.bf16.msrb.mxu0 %v904_v14 }
  0x2d   : > { %598 = vmatpush.bf16.msra.mxu2 %v912_v49 }
  0x8e   : > { %v368_v18 = vpop.f32.mrf.mxu0 }
  0x8f   : > { %v378_v19 = vpack.c.bf16 %v368_v18, %v368_v18  ;;  %v922_v18 = vld [vmem:[%s1121_s7 + $0x10] sm:$0xff] }
  0x90   : > { %715 = vmatpush.bf16.msra.mxu3 %v922_v18 }
  0x91   : > { %v387_v23 = vunpack.c.l.bf16 %v378_v19  ;;  %v921_v19 = vld [vmem:[%s1121_s7 + $0x8] sm:$0xff] }
  0x93   : > { %v392_v28 = vadd.f32 %v391_v24, %v387_v23  ;;  %v616_v23 = vpack.i.b16 %v614_v22, %v614_v22 }
  0x94   : > { %716 = vmatpush.bf16.msra.mxu3 %v921_v19 }
  0x95   : > { %v404_v31 = vmax.f32 %v392_v28, 0.0 }
  0x96   : > { %v370_v25 = vpop.f32.mrf.mxu0 }
  0x97   : > { %v379_v26 = vpack.c.bf16 %v370_v25, %v370_v25 }
  0x98   : > { %717 = vmatpush.bf16.msra.mxu3 %v920_v20 }
  0x99   : > { %v388_v29 = vunpack.c.l.bf16 %v379_v26  ;;  %v618_v26 = vperm.slane %v616_v23, 0 }
  0x9b   : > { %v393_v30 = vadd.f32 %v391_v24, %v388_v29  ;;  %v623_v28 = vunpack.c.l.bf16 %v618_v26 }
  0x9d   : > { %v405_v32 = vmax.f32 %v393_v30, 0.0 }
  0x9e   : > { %v373_v33 = vpop.f32.mrf.mxu0 }
  0x9f   : > { %v408_v34 = vpack.c.bf16 %v405_v32, %v404_v31  ;;  %v380_v35 = vpack.c.bf16 %v373_v33, %v373_v33 }
  0xa1   : > { %483 = vmatmul.bf16.vlgmr.msrb.gmra.mxu0 %v408_v34  ;;  %v389_v36 = vunpack.c.l.bf16 %v380_v35 }
  0xa3   : > { %v394_v39 = vadd.f32 %v391_v24, %v389_v36 }
  0xa5   : > { %v406_v42 = vmax.f32 %v394_v39, 0.0 }
  0xa6   : > { %v375_v37 = vpop.f32.mrf.mxu0 }
  0xa7   : > { %v381_v38 = vpack.c.bf16 %v375_v37, %v375_v37 }
  0xa9   : > { %v390_v40 = vunpack.c.l.bf16 %v381_v38 }
  0xab   : > { %v395_v41 = vadd.f32 %v391_v24, %v390_v40 }
  0xad   : > { %v407_v43 = vmax.f32 %v395_v41, 0.0 }
  0xaf   : > { %v409_v44 = vpack.c.bf16 %v407_v43, %v406_v42 }
  0xb1   : > { %488 = vmatmul.bf16.vlgmr.msra.gmra.mxu1 %v409_v44 }
 0x11e   : > { %v484_v53 = vpop.f32.mrf.mxu0 }
 0x11f   : > { %v494_v54 = vpack.c.bf16 %v484_v53, %v484_v53 }
 0x121   : > { %v503_v58 = vunpack.c.l.bf16 %v494_v54 }
 0x123   : > { %v508_v63 = vadd.f32 %v507_v59, %v503_v58 }
 0x125   : > { %v520_v3 = vmax.f32 %v508_v63, 0.0 }
 0x126   : > { %v486_v60 = vpop.f32.mrf.mxu0 }
 0x127   : > { %v495_v61 = vpack.c.bf16 %v486_v60, %v486_v60 }
 0x129   : > { %v504_v0 = vunpack.c.l.bf16 %v495_v61 }
 0x12b   : > { %v509_v1 = vadd.f32 %v507_v59, %v504_v0 }
 0x12d   : > { %v521_v2 = vmax.f32 %v509_v1, 0.0 }
 0x12e   : > { %v489_v4 = vpop.f32.mrf.mxu1 }
 0x12f   : > { %v524_v5 = vpack.c.bf16 %v521_v2, %v520_v3  ;;  %v496_v6 = vpack.c.bf16 %v489_v4, %v489_v4 }
 0x131   : > { %599 = vmatmul.bf16.vlgmr.msra.gmra.mxu2 %v524_v5  ;;  %v505_v7 = vunpack.c.l.bf16 %v496_v6 }
 0x133   : > { %v510_v10 = vadd.f32 %v507_v59, %v505_v7 }
 0x135   : > { %v522_v14 = vmax.f32 %v510_v10, 0.0 }
 0x136   : > { %v491_v8 = vpop.f32.mrf.mxu1 }
 0x137   : > { %v497_v9 = vpack.c.bf16 %v491_v8, %v491_v8 }
 0x139   : > { %v506_v11 = vunpack.c.l.bf16 %v497_v9 }
 0x13b   : > { %v511_v12 = vadd.f32 %v507_v59, %v506_v11 }
 0x13d   : > { %v523_v13 = vmax.f32 %v511_v12, 0.0 }
 0x13f   : > { %v525_v15 = vpack.c.bf16 %v523_v13, %v522_v14 }
 0x141   : > { %604 = vmatmul.bf16.gmra.mxu2 %v525_v15 }
 0x1b4   : > { %v600_v24 = vpop.f32.mrf.mxu2 }
 0x1b5   : > { %v610_v25 = vpack.c.bf16 %v600_v24, %v600_v24 }
 0x1b7   : > { %v619_v27 = vunpack.c.l.bf16 %v610_v25 }
 0x1b9   : > { %v624_v31 = vadd.f32 %v623_v28, %v619_v27 }
 0x1bb   : > { %v636_v34 = vmax.f32 %v624_v31, 0.0 }
 0x1bc   : > { %v602_v29 = vpop.f32.mrf.mxu2 }
 0x1bd   : > { %v611_v30 = vpack.c.bf16 %v602_v29, %v602_v29 }
 0x1bf   : > { %v620_v32 = vunpack.c.l.bf16 %v611_v30 }
 0x1c1   : > { %v625_v33 = vadd.f32 %v623_v28, %v620_v32 }
 0x1c3   : > { %v637_v35 = vmax.f32 %v625_v33, 0.0 }
 0x1c4   : > { %v605_v36 = vpop.f32.mrf.mxu2 }
 0x1c5   : > { %v640_v37 = vpack.c.bf16 %v637_v35, %v636_v34  ;;  %v612_v38 = vpack.c.bf16 %v605_v36, %v605_v36 }
 0x1c7   : > { %718 = vmatmul.bf16.vlgmr.msra.gmra.mxu3 %v640_v37  ;;  %v621_v39 = vunpack.c.l.bf16 %v612_v38 }
 0x1c9   : > { %v626_v42 = vadd.f32 %v623_v28, %v621_v39 }
 0x1cb   : > { %v638_v46 = vmax.f32 %v626_v42, 0.0 }
 0x1cc   : > { %v607_v40 = vpop.f32.mrf.mxu2 }
 0x1cd   : > { %v613_v41 = vpack.c.bf16 %v607_v40, %v607_v40 }
 0x1cf   : > { %v622_v43 = vunpack.c.l.bf16 %v613_v41 }
 0x1d1   : > { %v627_v44 = vadd.f32 %v623_v28, %v622_v43 }
 0x1d3   : > { %v639_v45 = vmax.f32 %v627_v44, 0.0 }
 0x1d5   : > { %v641_v47 = vpack.c.bf16 %v639_v45, %v638_v46 }
 0x1d7   : > { %723 = vmatmul.bf16.gmra.mxu3 %v641_v47 }
 0x24a   : > { %v719_v49 = vpop.f32.mrf.mxu3 }
 0x24b   : > { %v720_v50 = vadd.f32 %v944_v48, %v719_v49 }
 0x24d   : > { %730 = vst.msk [vmem:[%s334_s22] sm:$0xff] %vm729_vm1, %v720_v50 }
 0x252   : > { %v721_v51 = vpop.f32.mrf.mxu3 }
 0x253   : > { %v722_v52 = vadd.f32 %v944_v48, %v721_v51 }
 0x255   : > { %731 = vst.msk [vmem:[%s334_s22 + $0x8] sm:$0xff] %vm729_vm1, %v722_v52 }
 0x25a   : > { %v724_v53 = vpop.f32.mrf.mxu3 }
 0x25b   : > { %v725_v54 = vadd.f32 %v944_v48, %v724_v53 }
 0x25d   : > { %732 = vst.msk [vmem:[%s334_s22 + $0x10] sm:$0xff] %vm729_vm1, %v725_v54 }
 0x262   : > { %v726_v55 = vpop.f32.mrf.mxu3 }
 0x263   : > { %v727_v56 = vadd.f32 %v944_v48, %v726_v55 }
 0x265   : > { %733 = vst.msk [vmem:[%s334_s22 + $0x18] sm:$0xff] %vm729_vm1, %v727_v56 }
 0x266 PF: > { %s19_s30 = sadd.s32 1, %s951_s30  }
 0x267   : > { %p16_p4 = scmp.ge.s32.totalorder %s19_s30, 4  }
 0x269   :  { %18 = sbr.rel (!%p16_p4) target bundleno = 1 (0x1), region = 86 }

</bundles_post_ra>
